<compile_context>
chip_gen: v7x
topology: tpu7x:2x2x1
jax: 0.10.0
libtpu: 0.0.40
codegen_flags: <defaults>
</compile_context>

<pallas_src>
import jax
import jax.numpy as jnp
from jax.experimental import pallas as pl
from jax.experimental.pallas import tpu as pltpu


_MIN_GRID = 8                        # pipeline depth target / v7x 2-TC sharding
_TARGET_BLOCK_BYTES = 2 * 1024 * 1024
_VMEM_BUDGET = 24 * 1024 * 1024      # double-buffered blocks + in-kernel f32 temps
_VMEM_LIMIT = 48 * 1024 * 1024       # scoped limit; headroom under v7x's 64 MiB


def _round_up(v, m):
    return -(-v // m) * m


def _softpool_kernel(x_ref, s_ref, o_ref):
    """SoftPool over one block of output rows.

    x_ref: (R, kh*Wf)  R output rows; each row holds its kh x (Wo*kw) window
                       data in natural NCHW order (Wf = Wo*kw).
    s_ref: (Wf, Wo)    constant 0/1 selection matrix (bf16): sums each group of
                       kw lanes and lane-compacts to Wo dense output lanes.
    o_ref: (R, Wo)
    """
    wf = s_ref.shape[0]
    kh = x_ref.shape[1] // wf

    # Small-kh accumulation loop: only (R, Wf)-sized f32 temporaries stay live.
    xs = x_ref[:, 0:wf].astype(jnp.float32)
    e = jnp.exp(xs)                               # EUP
    den = e
    num = e * xs
    for i in range(1, kh):
        xs = x_ref[:, i * wf:(i + 1) * wf].astype(jnp.float32)
        e = jnp.exp(xs)
        den = den + e
        num = num + e * xs

    # kw-sum + lane compaction on the idle MXU.  Exact bf16 hi/lo splitting of
    # the f32 slabs keeps the 0/1 matmul accurate to ~2^-18 relative.
    s = s_ref[...]

    def select_sum(v):
        hi = v.astype(jnp.bfloat16)
        lo = (v - hi.astype(jnp.float32)).astype(jnp.bfloat16)
        return (jnp.dot(hi, s, preferred_element_type=jnp.float32)
                + jnp.dot(lo, s, preferred_element_type=jnp.float32))

    num_o = select_sum(num)
    den_o = select_sum(den)
    # TODO(synk): like the reference module, no exp(x - max) stabilization;
    # exact per-window max in this fused layout needs a lane-group max network.
    o_ref[...] = (num_o / den_o).astype(o_ref.dtype)


def soft_pooling_2d(x, kernel_size, stride=None, padding=0):
    """SoftPooling2D forward.  x is NCHW (f32 or bf16; math done in f32)."""
    if stride is None:
        stride = kernel_size
    assert padding == 0, "padding != 0 not supported"
    assert stride == kernel_size, "stride != kernel_size not supported"

    n, c, h, w = x.shape
    kh = kw = kernel_size
    ho, wo = h // kh, w // kw
    assert ho > 0 and wo > 0
    if h != ho * kh or w != wo * kw:
        # AvgPool2d floors the output size; crop the ragged border (only this
        # case costs an extra XLA copy).
        x = x[:, :, : ho * kh, : wo * kw]

    wf = wo * kw              # lane width of one kh-slab
    lanes = kh * wf           # full window data per output row
    m_out = n * c * ho        # number of output rows

    # Free (no data movement) natural-layout view; replaces the old transpose.
    xr = x.reshape(m_out, lanes)

    # Constant 0/1 selection matrix: S[w, j] = 1 iff w // kw == j.
    sel_mat = (jnp.arange(wf, dtype=jnp.int32)[:, None] // kw
               == jnp.arange(wo, dtype=jnp.int32)[None, :]).astype(jnp.bfloat16)

    # ---- row-block selection (prefer big blocks; keep grid >= 2; fit VMEM) --
    itemsize = jnp.dtype(x.dtype).itemsize
    align = 16 if itemsize < 4 else 8            # full sublane packing for bf16
    row_in_bytes = lanes * itemsize
    # 2x double-buffered in/out blocks + ~6 f32 (R, Wf) slab temps in-kernel.
    per_row_bytes = 2 * row_in_bytes + 6 * wf * 4 + 2 * wo * 4
    sel_bytes = 2 * wf * wo * 2
    ro_cap = max(align,
                 ((_VMEM_BUDGET - sel_bytes) // per_row_bytes) // align * align)

    ro = max(_round_up(pl.cdiv(m_out, _MIN_GRID), align),               # >=8 steps
             _round_up(pl.cdiv(_TARGET_BLOCK_BYTES, row_in_bytes), align))
    ro = min(ro, ro_cap)                                                 # VMEM cap
    ro = min(ro, _round_up(pl.cdiv(m_out, 2), align))                    # >=2 steps
    ro = max(ro, align)
    ro = min(ro, _round_up(m_out, align))
    grid = pl.cdiv(m_out, ro)

    out = pl.pallas_call(
        _softpool_kernel,
        out_shape=jax.ShapeDtypeStruct((m_out, wo), x.dtype),
        grid=(grid,),
        in_specs=[
            pl.BlockSpec((ro, lanes), lambda i: (i, 0)),
            pl.BlockSpec((wf, wo), lambda i: (0, 0)),   # resident across steps
        ],
        out_specs=pl.BlockSpec((ro, wo), lambda i: (i, 0)),
        compiler_params=pltpu.CompilerParams(
            dimension_semantics=("parallel",),
            vmem_limit_bytes=_VMEM_LIMIT,
        ),
    )(xr, sel_mat)

    return out.reshape(n, c, ho, wo)


def _reference(x, kernel_size):
    # Pure-JAX reference matching the PyTorch module (padding=0, stride=k).
    k = kernel_size
    xf = x.astype(jnp.float32)

    def sum_pool(a):
        return jax.lax.reduce_window(
            a, 0.0, jax.lax.add,
            window_dimensions=(1, 1, k, k),
            window_strides=(1, 1, k, k),
            padding="VALID",
        )

    xe = jnp.exp(xf)
    return sum_pool(xe * xf) / sum_pool(xe)   # AvgPool divisors cancel


if __name__ == "__main__":
    # Main check: f32, 2x2 windows, multi-block grid.
    x = jax.random.normal(jax.random.PRNGKey(0), (2, 4, 16, 16), dtype=jnp.float32)
    y = jax.block_until_ready(soft_pooling_2d(x, kernel_size=2))
    assert y.shape == (2, 4, 8, 8)
    assert jnp.allclose(y, _reference(x, 2), atol=2e-5, rtol=2e-5), "f32 k=2 mismatch"

    # 3x3 windows with a ragged border (crop path) and a partial final block.
    x3 = jax.random.normal(jax.random.PRNGKey(1), (1, 3, 17, 17), dtype=jnp.float32)
    y3 = jax.block_until_ready(soft_pooling_2d(x3, kernel_size=3))
    assert y3.shape == (1, 3, 5, 5)
    assert jnp.allclose(y3, _reference(x3, 3), atol=2e-5, rtol=2e-5), "f32 k=3 mismatch"

    # bf16 input / output path (16-sublane alignment).
    xb = jax.random.normal(jax.random.PRNGKey(2), (2, 4, 16, 16), dtype=jnp.bfloat16)
    yb = jax.block_until_ready(soft_pooling_2d(xb, kernel_size=2))
    assert yb.shape == (2, 4, 8, 8)
    assert jnp.allclose(yb.astype(jnp.float32), _reference(xb, 2),
                        atol=2e-2, rtol=2e-2), "bf16 k=2 mismatch"

    print("KERNEL_OK")
</pallas_src>

<mosaic_0001>
module attributes {stable_mosaic.version = 11 : i64} {
  func.func @_softpool_kernel(%arg0: i32, %arg1: memref<32x32xf32, #tpu.memory_space<vmem>>, %arg2: memref<16x8xbf16, #tpu.memory_space<vmem>>, %arg3: memref<32x8xf32, #tpu.memory_space<vmem>>) attributes {dimension_semantics = [#tpu.dimension_semantics<parallel>], iteration_bounds = array<i64: 2>, scalar_prefetch = 0 : i64, scratch_operands = 0 : i64, tpu.core_type = #tpu.core_type<tc>, window_params = [{transform_indices = @transform_0, window_bounds = array<i64: 32, 32>}, {pipeline_mode = #tpu.pipeline_mode<synchronous>, transform_indices = @transform_1, window_bounds = array<i64: 16, 8>}, {transform_indices = @transform_2, window_bounds = array<i64: 32, 8>}]} {
    %c0 = arith.constant 0 : index
    %c0_0 = arith.constant 0 : index
    %0 = vector.load %arg1[%c0, %c0_0] : memref<32x32xf32, #tpu.memory_space<vmem>>, vector<32x16xf32>
    %1 = math.exp %0 : vector<32x16xf32>
    %2 = arith.mulf %1, %0 : vector<32x16xf32>
    %c0_1 = arith.constant 0 : index
    %c16 = arith.constant 16 : index
    %3 = vector.load %arg1[%c0_1, %c16] : memref<32x32xf32, #tpu.memory_space<vmem>>, vector<32x16xf32>
    %4 = math.exp %3 : vector<32x16xf32>
    %5 = arith.addf %1, %4 : vector<32x16xf32>
    %6 = arith.mulf %4, %3 : vector<32x16xf32>
    %7 = arith.addf %2, %6 : vector<32x16xf32>
    %c0_2 = arith.constant 0 : index
    %c0_3 = arith.constant 0 : index
    %8 = vector.load %arg2[%c0_2, %c0_3] : memref<16x8xbf16, #tpu.memory_space<vmem>>, vector<16x8xbf16>
    %9 = arith.truncf %7 : vector<32x16xf32> to vector<32x16xbf16>
    %10 = arith.extf %9 : vector<32x16xbf16> to vector<32x16xf32>
    %11 = arith.subf %7, %10 : vector<32x16xf32>
    %12 = arith.truncf %11 : vector<32x16xf32> to vector<32x16xbf16>
    %cst = arith.constant dense<0.000000e+00> : vector<32x8xf32>
    %13 = tpu.matmul %9, %8, %cst {dimension_numbers = #tpu.dot_dimension_numbers<[1], [0], [0], [1], [0, 0, 1, 1], [], []>} : vector<32x16xbf16>, vector<16x8xbf16>, vector<32x8xf32> -> vector<32x8xf32>
    %cst_4 = arith.constant dense<0.000000e+00> : vector<32x8xf32>
    %14 = tpu.matmul %12, %8, %cst_4 {dimension_numbers = #tpu.dot_dimension_numbers<[1], [0], [0], [1], [0, 0, 1, 1], [], []>} : vector<32x16xbf16>, vector<16x8xbf16>, vector<32x8xf32> -> vector<32x8xf32>
    %15 = arith.addf %13, %14 : vector<32x8xf32>
    %16 = arith.truncf %5 : vector<32x16xf32> to vector<32x16xbf16>
    %17 = arith.extf %16 : vector<32x16xbf16> to vector<32x16xf32>
    %18 = arith.subf %5, %17 : vector<32x16xf32>
    %19 = arith.truncf %18 : vector<32x16xf32> to vector<32x16xbf16>
    %cst_5 = arith.constant dense<0.000000e+00> : vector<32x8xf32>
    %20 = tpu.matmul %16, %8, %cst_5 {dimension_numbers = #tpu.dot_dimension_numbers<[1], [0], [0], [1], [0, 0, 1, 1], [], []>} : vector<32x16xbf16>, vector<16x8xbf16>, vector<32x8xf32> -> vector<32x8xf32>
    %cst_6 = arith.constant dense<0.000000e+00> : vector<32x8xf32>
    %21 = tpu.matmul %19, %8, %cst_6 {dimension_numbers = #tpu.dot_dimension_numbers<[1], [0], [0], [1], [0, 0, 1, 1], [], []>} : vector<32x16xbf16>, vector<16x8xbf16>, vector<32x8xf32> -> vector<32x8xf32>
    %22 = arith.addf %20, %21 : vector<32x8xf32>
    %23 = arith.divf %15, %22 : vector<32x8xf32>
    %c0_7 = arith.constant 0 : index
    %c0_8 = arith.constant 0 : index
    %24 = vector.load %arg3[%c0_7, %c0_8] : memref<32x8xf32, #tpu.memory_space<vmem>>, vector<32x8xf32>
    tpu.vector_store %arg3[%c0_7, %c0_8], %23 {strides = array<i32>} : memref<32x8xf32, #tpu.memory_space<vmem>>, vector<32x8xf32>,
    return
  }
  func.func @transform_0(%arg0: i32) -> (i32, i32) {
    %c0_i32 = arith.constant 0 : i32
    %c0_i32_0 = arith.constant 0 : i32
    return %arg0, %c0_i32 : i32, i32
  }
  func.func @transform_1(%arg0: i32) -> (i32, i32) {
    %c0_i32 = arith.constant 0 : i32
    %c0_i32_0 = arith.constant 0 : i32
    %c0_i32_1 = arith.constant 0 : i32
    return %c0_i32, %c0_i32_0 : i32, i32
  }
  func.func @transform_2(%arg0: i32) -> (i32, i32) {
    %c0_i32 = arith.constant 0 : i32
    %c0_i32_0 = arith.constant 0 : i32
    return %arg0, %c0_i32 : i32, i32
  }
}

</mosaic_0001>

<bundles_post_ra>
// kernel: tpu_custom_call.1
= control target key start
LH: loop header
LB: loop body
LE: loop exit
PB: predicated region body
PF: predicated region fallthrough
CT: control target
= control target key end

     0   :  { %s640_s9 = smov 0   ;;  %s685_s0 = inlined_call_operand.vmem [shape: f32[64,32], index: 0, kind: input, shape index: {}]   ;;  %s686_s1 = inlined_call_operand.vmem [shape: bf16[16,8], index: 1, kind: input, shape index: {}]   ;;  %s687_s2 = inlined_call_operand.vmem [shape: f32[64,8], index: 2, kind: output, shape index: {}]  }
   0x1 LB: > { %s526_s10 = sadd.s32 4294967295, %s622_s9   ;;  %p530_p0 = scmp.ge.s32.totalorder %s622_s9, 1  ;;  %s622_s9 = sphi %s640_s9, %s12_s9  }
   0x2   : > { %p113_p1 = scmp.lt.s32.totalorder %s622_s9, 3 }
   0x4   : > { %p114_p2 = pnand %p530_p0, %p113_p1 }
   0x5   : > { %s531_s11 = sshll.u32 (!%p114_p2), %s526_s10, 2  ;;  %v659_v8 = vld [vmem:[%s686_s1] sm:$0xff] (!%p114_p2)   ;;  %s624_s18 = smov (!%p114_p2), 112   ;;  %vm224_vm0 = vcmask (!%p114_p2), 130048   ;;  %vm465_vm1 = vcmask (!%p114_p2), 64512  }
   0x6   : > { %117 = sbr.rel (%p114_p2) target bundleno = 402 (0x192), region = 28  ;;  %p136_p3 = scmp.lt.s32.totalorder (!%p114_p2), %s531_s11, 7  ;;  %570 = vmatprep.subr.bf16.mxu1 (!%p114_p2), %v659_v8  ;;  %558 = vmatprep.subr.bf16.mxu0 (!%p114_p2), %v659_v8 }
   0x7   : > { %571 = vmatpush3.bf16.msra.mxu1 (!%p114_p2), %v659_v8  ;;  %559 = vmatpush3.bf16.msra.mxu0 (!%p114_p2), %v659_v8 }
   0x8   : > { %576 = vmatprep.subr.bf16.mxu1 (!%p114_p2), %v659_v8  ;;  %564 = vmatprep.subr.bf16.mxu0 (!%p114_p2), %v659_v8 }
   0xd   : > { %s689_s11 = smov (!%p136_p3, %s531_s11), 7 }
   0xe   : > { %s532_s12 = sshll.u32 %s689_s11, 3 }
   0xf   : > { %s139_s15 = scalar_lea.vmem %s685_s0, %s532_s12  ;;  %s145_s21 = scalar_lea.vmem %s687_s2, %s532_s12 }
  0x10   : > { %v150_v0 = vld [vmem:[%s139_s15 + $0x10] sm:$0xff]  ;;  %v148_v1 = vld [vmem:[%s139_s15] sm:$0xff]  ;;  %v151_v2 = vld [vmem:[%s139_s15 + $0x18] sm:$0xff] }
  0x11   : > { %v156_v3 = vmul.f32 1.442695, %v150_v0  ;;  %v152_v4 = vmul.f32 1.442695, %v148_v1  ;;  %v158_v5 = vmul.f32 1.442695, %v151_v2 }
  0x12   : > { %v149_v6 = vld [vmem:[%s139_s15 + $0x8] sm:$0xff] }
  0x13   : > { %600 = vpow2.f32 %v156_v3  ;;  %v154_v7 = vmul.f32 1.442695, %v149_v6 }
  0x14   : > { %602 = vpow2.f32 %v152_v4 }
  0x15   : > { %604 = vpow2.f32 %v158_v5 }
  0x16   : > { %606 = vpow2.f32 %v154_v7 }
  0x1d   : > { %v601_v9 = vpop.eup %600 }
  0x1e   : > { %v603_v10 = vpop.eup %602  ;;  %172 = vrot.lane.b32.xlu1 %v601_v9, %s624_s18  ;;  %v162_v16 = vmul.f32 %v601_v9, %v150_v0 }
  0x1f   : > { %v605_v11 = vpop.eup %604  ;;  %168 = vrot.lane.b32.xlu0 %v603_v10, %s624_s18  ;;  %v160_v14 = vmul.f32 %v603_v10, %v148_v1 }
  0x20   : > { %v607_v12 = vpop.eup %606  ;;  %v163_v15 = vmul.f32 %v605_v11, %v151_v2 }
  0x21   : > { %v161_v13 = vmul.f32 %v607_v12, %v149_v6 }
  0x22   : > { %174 = vrot.lane.b32.xlu1 %v605_v11, %s624_s18 }
  0x23   : > { %170 = vrot.lane.b32.xlu0 %v607_v12, %s624_s18 }
  0x26   : > { %190 = vrot.lane.b32.xlu1 %v161_v13, %s624_s18 }
  0x27   : > { %188 = vrot.lane.b32.xlu0 %v160_v14, %s624_s18 }
  0x2a   : > { %194 = vrot.lane.b32.xlu1 %v163_v15, %s624_s18 }
  0x2b   : > { %192 = vrot.lane.b32.xlu0 %v162_v16, %s624_s18 }
  0x90   : > { %v173_v17 = vpop.permute.xlu1 %172 }
  0x91   : > { %v169_v18 = vpop.permute.xlu0 %168  ;;  %v182_v20 = vadd.f32 %v601_v9, %v173_v17 }
  0x92   : > { %v180_v23 = vadd.f32 %v603_v10, %v169_v18 }
  0x94   : > { %v175_v19 = vpop.permute.xlu1 %174 }
  0x95   : > { %v183_v21 = vadd.f32 %v605_v11, %v175_v19  ;;  %v171_v22 = vpop.permute.xlu0 %170 }
  0x96   : > { %v181_v24 = vadd.f32 %v607_v12, %v171_v22 }
  0x97   : > { %v336_v25 = vpack.c.bf16 %v183_v21, %v182_v20 }
  0x98   : > { %v335_v26 = vpack.c.bf16 %v181_v24, %v180_v23  ;;  %v191_v27 = vpop.permute.xlu1 %190 }
  0x99   : > { %v339_v28 = vunpack.c.l.bf16 %v336_v25  ;;  %v340_v29 = vunpack.c.h.bf16 %v336_v25  ;;  %v201_v30 = vadd.f32 %v191_v27, %v161_v13  ;;  %v189_v31 = vpop.permute.xlu0 %188 }
  0x9a   : > { %v338_v32 = vunpack.c.h.bf16 %v335_v26  ;;  %v200_v33 = vadd.f32 %v189_v31, %v160_v14  ;;  %v337_v34 = vunpack.c.l.bf16 %v335_v26 }
  0x9b   : > { %v343_v35 = vsub.f32 %v182_v20, %v339_v28  ;;  %v344_v36 = vsub.f32 %v183_v21, %v340_v29 }
  0x9c   : > { %v342_v37 = vsub.f32 %v181_v24, %v338_v32  ;;  %v206_v38 = vpack.c.bf16 %v201_v30, %v200_v33  ;;  %v195_v39 = vpop.permute.xlu1 %194  ;;  %v341_v40 = vsub.f32 %v180_v23, %v337_v34 }
  0x9d   : > { %v346_v41 = vpack.c.bf16 %v344_v36, %v343_v35  ;;  %v203_v42 = vadd.f32 %v195_v39, %v163_v15  ;;  %v193_v43 = vpop.permute.xlu0 %192 }
  0x9e   : > { %v208_v44 = vunpack.c.l.bf16 %v206_v38  ;;  %v202_v45 = vadd.f32 %v193_v43, %v162_v16  ;;  %v345_v46 = vpack.c.bf16 %v342_v37, %v341_v40  ;;  %v209_v47 = vunpack.c.h.bf16 %v206_v38 }
  0xa0   : > { %v212_v48 = vsub.f32 %v200_v33, %v208_v44  ;;  %v207_v49 = vpack.c.bf16 %v203_v42, %v202_v45  ;;  %572 = vmatprep.mubr.msk.bf16.mxu1 %vm224_vm0, %v345_v46  ;;  %v213_v50 = vsub.f32 %v201_v30, %v209_v47 }
  0xa1   : > { %573 = vmatmul.mubr.msk.bf16.vlgmr.msra.gmra.mrb[0].mxu1 %vm224_vm0, %v346_v41 }
  0xa2   : > { %v210_v51 = vunpack.c.l.bf16 %v207_v49  ;;  %v211_v52 = vunpack.c.h.bf16 %v207_v49  ;;  %577 = vmatpush3.bf16.msra.mxu1 %v659_v8  ;;  %578 = vmatprep.mubr.msk.bf16.mxu1 %vm224_vm0, %v335_v26  ;;  %v216_v53 = vpack.c.bf16 %v213_v50, %v212_v48 }
  0xa4   : > { %v214_v54 = vsub.f32 %v202_v45, %v210_v51  ;;  %v215_v55 = vsub.f32 %v203_v42, %v211_v52  ;;  %560 = vmatprep.mubr.msk.bf16.mxu0 %vm224_vm0, %v216_v53 }
  0xa6   : > { %v217_v56 = vpack.c.bf16 %v215_v55, %v214_v54 }
  0xa8   : > { %561 = vmatmul.mubr.msk.bf16.vlgmr.msra.gmra.mrb[0].mxu0 %vm224_vm0, %v217_v56 }
  0xa9   : > { %566 = vmatprep.mubr.msk.bf16.mxu0 %vm224_vm0, %v206_v38  ;;  %565 = vmatpush3.bf16.msra.mxu0 %v659_v8 }
  0xad   : > { %579 = vmatmul.mubr.msk.bf16.vlgmr.msra.gmra.mrb[0].mxu1 %vm224_vm0, %v336_v25 }
  0xb4   : > { %567 = vmatmul.mubr.msk.bf16.vlgmr.msra.gmra.mrb[0].mxu0 %vm224_vm0, %v207_v49 }
 0x180   : > { %v580_v57 = vpop.f32.mrb[0].mxu1 }
 0x181   : > { %608 = vrcp.f32 %v580_v57  ;;  %v442_v58 = vpop.f32.mrb[1].mxu1 }
 0x182   : > { %610 = vrcp.f32 %v442_v58  ;;  %v581_v59 = vpop.f32.mrb[2].mxu1 }
 0x183   : > { %612 = vrcp.f32 %v581_v59  ;;  %v445_v60 = vpop.f32.mrb[3].mxu1 }
 0x184   : > { %614 = vrcp.f32 %v445_v60 }
 0x187   : > { %v568_v61 = vpop.f32.mrb[0].mxu0 }
 0x188   : > { %v320_v62 = vpop.f32.mrb[1].mxu0 }
 0x189   : > { %v569_v63 = vpop.f32.mrb[2].mxu0 }
 0x18a   : > { %v323_v0 = vpop.f32.mrb[3].mxu0 }
 0x18b   : > { %v609_v1 = vpop.eup %608 }
 0x18c   : > { %v611_v2 = vpop.eup %610  ;;  %v462_v3 = vmul.f32 %v609_v1, %v568_v61 }
 0x18d   : > { %v613_v4 = vpop.eup %612  ;;  %v458_v5 = vmul.f32 %v611_v2, %v320_v62 }
 0x18e   : > { %v615_v6 = vpop.eup %614  ;;  %v464_v7 = vmul.f32 %v613_v4, %v569_v63  ;;  %468 = vst.msk [vmem:[%s145_s21 + $0x10] sm:$0xff] %vm465_vm1, %v462_v3 }
 0x18f   : > { %466 = vst.msk [vmem:[%s145_s21] sm:$0xff] %vm465_vm1, %v458_v5  ;;  %v460_v8 = vmul.f32 %v615_v6, %v323_v0 }
 0x190   : > { %469 = vst.msk [vmem:[%s145_s21 + $0x18] sm:$0xff] %vm465_vm1, %v464_v7 }
 0x191   : > { %467 = vst.msk [vmem:[%s145_s21 + $0x8] sm:$0xff] %vm465_vm1, %v460_v8 }
 0x192 PF: > { %s12_s9 = sadd.s32 1, %s622_s9  }
 0x193   : > { %p9_p4 = scmp.ge.s32.totalorder %s12_s9, 4  }
 0x195   :  { %11 = sbr.rel (!%p9_p4) target bundleno = 1 (0x1), region = 58 }

</bundles_post_ra>
